<compile_context>
chip_gen: v7x
topology: tpu7x:2x2x1
jax: 0.10.0
libtpu: 0.0.40
codegen_flags: <defaults>
</compile_context>

<pallas_src>
import functools

import jax
import jax.numpy as jnp
from jax.experimental import pallas as pl
from jax.experimental.pallas import tpu as pltpu


def _mlp_kernel(x_ref, w_ref, o_ref, acc_ref, *, inv_s, n_groups):
    """One grid step of the fused avg-pool + linear head.

    x_ref  : (b_tile, C, s_chunk)   input tile (native dtype)
    w_ref  : (C, O)                 Linear weight, pre-transposed in the wrapper
    o_ref  : (1, b_tile, O) f32     per-split partial logits (bias added in wrapper)
    acc_ref: (b_tile, C, 128) f32   lane-dense running spatial-sum scratch
    inv_s  : 1 / true_spatial_size  (static Python float)
    n_groups: s_chunk // 128        (static Python int)
    """
    s = pl.program_id(2)

    @pl.when(s == 0)
    def _init():
        acc_ref[...] = jnp.zeros_like(acc_ref)

    # Streaming loop: pure VPU.  Add the s_chunk//128 lane groups elementwise
    # into a lane-dense partial (aligned 128-wide slices of the VMEM tile are
    # just vreg selections - no cross-lane/XLU work per step).  Zero padding
    # of the last chunk does not change the sum; the mean divides by true S.
    part = x_ref[:, :, 0:128].astype(jnp.float32)
    for g in range(1, n_groups):
        part = part + x_ref[:, :, g * 128:(g + 1) * 128].astype(jnp.float32)
    acc_ref[...] += part

    # Weight load, the single cross-lane reduce and the tiny MXU matmul are
    # touched only on the last chunk of this (split, batch_tile).
    @pl.when(s == pl.num_programs(2) - 1)
    def _finalize():
        pooled = jnp.sum(acc_ref[...], axis=-1) * inv_s                 # (b_tile, C)
        logits = jnp.dot(pooled, w_ref[...].astype(jnp.float32),
                         preferred_element_type=jnp.float32)            # (b_tile, O)
        o_ref[...] = logits[None]


def mlp_forward(x, weight, bias, *, b_tile=8, s_chunk=4096, force_pallas=False):
    """x: (B, C, *spatial); weight: (num_outputs, C) [PyTorch layout]; bias: (num_outputs,)."""
    x = jnp.asarray(x)
    weight = jnp.asarray(weight)
    bias = jnp.asarray(bias)

    B, C = x.shape[0], x.shape[1]
    x3 = x.reshape(B, C, -1)                        # flatten spatial dims -> (B, C, S)
    S = x3.shape[-1]
    num_outputs = weight.shape[0]

    # ---- small-problem fallback ------------------------------------------
    # Fixed pallas_call launch/pipeline overhead dominates tiny inputs; keep
    # the Pallas path for the large-S regime it is designed for.
    if not force_pallas and x3.size * x3.dtype.itemsize < (2 << 20):
        pooled = jnp.mean(x3.astype(jnp.float32), axis=-1)
        out = pooled @ weight.T.astype(jnp.float32) + bias.astype(jnp.float32)
        return out.astype(x.dtype)

    # ---- generation-aware VMEM budget -------------------------------------
    # ~3/4 of physical VMEM: 96 MiB on v5e/v6e (128 MiB), 48 MiB on v7x (64 MiB).
    try:
        vmem_cap = int(pltpu.get_tpu_info().vmem_capacity_bytes)
    except Exception:  # pragma: no cover - conservative default (v7x per-TC)
        vmem_cap = 64 * 1024 * 1024
    vmem_budget = min(vmem_cap * 3 // 4, 100 * 1024 * 1024)

    # ---- tile sizing -------------------------------------------------------
    # Batch tile: multiple of 8 (f32 sublane) so the (b_tile, O) output block
    # is tiling-legal.  Prefer growing s_chunk over b_tile (rows of x3 are
    # contiguous along S, and small b_tile keeps batch tiles available for
    # megacore sharding).
    b_tile = max(8, int(pl.cdiv(b_tile, 8)) * 8)
    B_pad = int(pl.cdiv(B, b_tile)) * b_tile
    num_b_tiles = B_pad // b_tile

    # Spatial (reduction) chunk: lane-dense multiple of 128, clamped so the
    # double-buffered x tile stays within ~85% of the VMEM budget.
    itemsize = x3.dtype.itemsize
    max_chunk = max(
        128,
        ((vmem_budget * 85 // 100) // (2 * b_tile * C * itemsize)) // 128 * 128,
    )
    s_chunk = int(pl.cdiv(min(max(s_chunk, 128), max_chunk), 128)) * 128
    s_chunk = min(s_chunk, int(pl.cdiv(S, 128)) * 128)   # never exceed (padded) S

    total_chunks = int(pl.cdiv(S, s_chunk))

    # v7x megacore: with a single batch tile (small-batch inference) split the
    # spatial axis into two independent "parallel" halves (partial logits are
    # summed in the wrapper).  Costs one extra tiny finalize on 1-TC chips.
    n_split = 2 if (num_b_tiles == 1 and total_chunks >= 2) else 1
    chunks_per_split = int(pl.cdiv(total_chunks, n_split))
    S_pad = n_split * chunks_per_split * s_chunk

    if (B_pad, S_pad) != (B, S):
        # Zero padding: does not change the spatial sum; mean uses the true S.
        x3 = jnp.pad(x3, ((0, B_pad - B), (0, 0), (0, S_pad - S)))

    wt = weight.T                                    # (C, O): transpose once, in the wrapper

    grid = (n_split, num_b_tiles, chunks_per_split)
    kernel = functools.partial(_mlp_kernel, inv_s=1.0 / S, n_groups=s_chunk // 128)

    # TODO(synk): if an xprof trace still shows exposed DMA at step boundaries
    # for very small S, a 3rd buffer (pipeline_mode=pl.Buffered(3)) on the x
    # BlockSpec would hide the prefetch bubble; left at the default here.
    partial_logits = pl.pallas_call(
        kernel,
        out_shape=jax.ShapeDtypeStruct((n_split, B_pad, num_outputs), jnp.float32),
        grid_spec=pltpu.PrefetchScalarGridSpec(
            num_scalar_prefetch=0,
            grid=grid,
            in_specs=[
                pl.BlockSpec((b_tile, C, s_chunk),
                             lambda p, i, s: (i, 0, p * chunks_per_split + s)),
                pl.BlockSpec((C, num_outputs), lambda p, i, s: (0, 0)),
            ],
            out_specs=pl.BlockSpec((1, b_tile, num_outputs),
                                   lambda p, i, s: (p, i, 0)),
            scratch_shapes=[pltpu.VMEM((b_tile, C, 128), jnp.float32)],
        ),
        compiler_params=pltpu.CompilerParams(
            # split/batch tiles are independent (megacore-shardable); the
            # spatial reduction axis carries the accumulator -> arbitrary.
            dimension_semantics=("parallel", "parallel", "arbitrary"),
            vmem_limit_bytes=int(vmem_budget),
        ),
    )(x3, wt)

    # Combine split partial logits exactly once, add bias once, drop batch pad.
    logits = partial_logits.sum(axis=0)[:B] + bias.astype(jnp.float32)
    return logits.astype(x.dtype)


def reference_forward(x, weight, bias):
    B, C = x.shape[0], x.shape[1]
    x3 = x.reshape(B, C, -1)
    pooled = jnp.mean(x3, axis=-1)                  # (B, C)  adaptive avg pool to 1
    return pooled @ weight.T + bias                 # (B, num_outputs)


if __name__ == "__main__":
    key = jax.random.PRNGKey(0)

    # ---- test 1: small config (num_classes=2 -> num_outputs=1, num_tokens=32)
    num_tokens = 32
    num_outputs = 1                                 # num_classes == 2
    kx, kw, kb, key = jax.random.split(key, 4)
    x = jax.random.normal(kx, (2, num_tokens, 2, 2, 2, 4), dtype=jnp.float32)
    bound = 1.0 / (num_tokens ** 0.5)
    weight = jax.random.uniform(kw, (num_outputs, num_tokens),
                                minval=-bound, maxval=bound, dtype=jnp.float32)
    bias = jax.random.uniform(kb, (num_outputs,),
                              minval=-bound, maxval=bound, dtype=jnp.float32)

    out = jax.block_until_ready(mlp_forward(x, weight, bias, force_pallas=True))
    ref = reference_forward(x, weight, bias)
    assert out.shape == (2, num_outputs), out.shape
    assert jnp.allclose(out, ref, atol=1e-5, rtol=1e-5), (out, ref)

    # ---- test 2: module default num_tokens=96, non-aligned spatial extent.
    # Exercises batch padding, spatial zero padding, multiple spatial chunks,
    # the accumulator bracketing AND the 2-way spatial split (small batch).
    num_tokens2 = 96
    kx2, kw2, kb2, key = jax.random.split(key, 4)
    x2 = jax.random.normal(kx2, (4, num_tokens2, 2, 2, 2, 37), dtype=jnp.float32)
    bound2 = 1.0 / (num_tokens2 ** 0.5)
    weight2 = jax.random.uniform(kw2, (1, num_tokens2),
                                 minval=-bound2, maxval=bound2, dtype=jnp.float32)
    bias2 = jax.random.uniform(kb2, (1,),
                               minval=-bound2, maxval=bound2, dtype=jnp.float32)

    out2 = jax.block_until_ready(
        mlp_forward(x2, weight2, bias2, s_chunk=128, force_pallas=True))
    ref2 = reference_forward(x2, weight2, bias2)
    assert out2.shape == (4, 1), out2.shape
    assert jnp.allclose(out2, ref2, atol=1e-5, rtol=1e-5), (out2, ref2)

    # ---- test 3: auto small-problem fallback path (pure XLA) also matches.
    out3 = jax.block_until_ready(mlp_forward(x2, weight2, bias2))
    assert jnp.allclose(out3, ref2, atol=1e-5, rtol=1e-5), (out3, ref2)

    print("KERNEL_OK")
</pallas_src>

<mosaic_0001>
module attributes {stable_mosaic.version = 11 : i64} {
  func.func @_mlp_kernel(%arg0: i32, %arg1: i32, %arg2: i32, %arg3: memref<8x32x128xf32, #tpu.memory_space<vmem>>, %arg4: memref<32x1xf32, #tpu.memory_space<vmem>>, %arg5: memref<1x8x1xf32, #tpu.memory_space<vmem>>, %arg6: memref<8x32x128xf32, #tpu.memory_space<vmem>>) attributes {dimension_semantics = [#tpu.dimension_semantics<parallel>, #tpu.dimension_semantics<parallel>, #tpu.dimension_semantics<arbitrary>], iteration_bounds = array<i64: 1, 1, 1>, scalar_prefetch = 0 : i64, scratch_operands = 1 : i64, tpu.core_type = #tpu.core_type<tc>, window_params = [{transform_indices = @transform_0, window_bounds = array<i64: 8, 32, 128>}, {pipeline_mode = #tpu.pipeline_mode<synchronous>, transform_indices = @transform_1, window_bounds = array<i64: 32, 1>}, {transform_indices = @transform_2, window_bounds = array<i64: 1, 8, 1>}]} {
    %c0_i32 = arith.constant 0 : i32
    %0 = arith.cmpi eq, %arg2, %c0_i32 : i32
    %1 = arith.extui %0 : i1 to i32
    %c0_i32_0 = arith.constant 0 : i32
    %2 = arith.cmpi ne, %1, %c0_i32_0 : i32
    scf.if %2 {
      %cst = arith.constant 0.000000e+00 : f32
      %10 = vector.broadcast %cst : f32 to vector<8x32x128xf32>
      %c0_11 = arith.constant 0 : index
      %c0_12 = arith.constant 0 : index
      %c0_13 = arith.constant 0 : index
      %11 = vector.load %arg6[%c0_11, %c0_12, %c0_13] : memref<8x32x128xf32, #tpu.memory_space<vmem>>, vector<8x32x128xf32>
      tpu.vector_store %arg6[%c0_11, %c0_12, %c0_13], %10 {strides = array<i32>} : memref<8x32x128xf32, #tpu.memory_space<vmem>>, vector<8x32x128xf32>,
    } else {
    }
    %c0 = arith.constant 0 : index
    %c0_1 = arith.constant 0 : index
    %c0_2 = arith.constant 0 : index
    %3 = vector.load %arg3[%c0, %c0_1, %c0_2] : memref<8x32x128xf32, #tpu.memory_space<vmem>>, vector<8x32x128xf32>
    %c0_3 = arith.constant 0 : index
    %c0_4 = arith.constant 0 : index
    %c0_5 = arith.constant 0 : index
    %4 = vector.load %arg6[%c0_3, %c0_4, %c0_5] : memref<8x32x128xf32, #tpu.memory_space<vmem>>, vector<8x32x128xf32>
    %5 = arith.addf %4, %3 : vector<8x32x128xf32>
    %c0_6 = arith.constant 0 : index
    %c0_7 = arith.constant 0 : index
    %c0_8 = arith.constant 0 : index
    %6 = vector.load %arg6[%c0_6, %c0_7, %c0_8] : memref<8x32x128xf32, #tpu.memory_space<vmem>>, vector<8x32x128xf32>
    tpu.vector_store %arg6[%c0_6, %c0_7, %c0_8], %5 {strides = array<i32>} : memref<8x32x128xf32, #tpu.memory_space<vmem>>, vector<8x32x128xf32>,
    %c0_i32_9 = arith.constant 0 : i32
    %7 = arith.cmpi eq, %arg2, %c0_i32_9 : i32
    %8 = arith.extui %7 : i1 to i32
    %c0_i32_10 = arith.constant 0 : i32
    %9 = arith.cmpi ne, %8, %c0_i32_10 : i32
    scf.if %9 {
      %c0_11 = arith.constant 0 : index
      %c0_12 = arith.constant 0 : index
      %c0_13 = arith.constant 0 : index
      %10 = vector.load %arg6[%c0_11, %c0_12, %c0_13] : memref<8x32x128xf32, #tpu.memory_space<vmem>>, vector<8x32x128xf32>
      %cst = arith.constant dense<0.000000e+00> : vector<8x32xf32>
      %11 = vector.multi_reduction <add>, %10, %cst [2] : vector<8x32x128xf32> to vector<8x32xf32>
      %cst_14 = arith.constant 3.125000e-02 : f32
      %12 = vector.broadcast %cst_14 : f32 to vector<8x32xf32>
      %13 = arith.mulf %11, %12 : vector<8x32xf32>
      %c0_15 = arith.constant 0 : index
      %c0_16 = arith.constant 0 : index
      %14 = vector.load %arg4[%c0_15, %c0_16] : memref<32x1xf32, #tpu.memory_space<vmem>>, vector<32x1xf32>
      %cst_17 = arith.constant dense<0.000000e+00> : vector<8x1xf32>
      %15 = tpu.matmul %13, %14, %cst_17 {dimension_numbers = #tpu.dot_dimension_numbers<[1], [0], [0], [1], [0, 0, 1, 1], [], []>} : vector<8x32xf32>, vector<32x1xf32>, vector<8x1xf32> -> vector<8x1xf32>
      %16 = vector.shape_cast %15 : vector<8x1xf32> to vector<1x8x1xf32>
      %c0_18 = arith.constant 0 : index
      %c0_19 = arith.constant 0 : index
      %c0_20 = arith.constant 0 : index
      %17 = vector.load %arg5[%c0_18, %c0_19, %c0_20] : memref<1x8x1xf32, #tpu.memory_space<vmem>>, vector<1x8x1xf32>
      tpu.vector_store %arg5[%c0_18, %c0_19, %c0_20], %16 {strides = array<i32>} : memref<1x8x1xf32, #tpu.memory_space<vmem>>, vector<1x8x1xf32>,
    } else {
    }
    return
  }
  func.func @transform_0(%arg0: i32, %arg1: i32, %arg2: i32) -> (i32, i32, i32) {
    %c1_i32 = arith.constant 1 : i32
    %0 = arith.muli %arg0, %c1_i32 : i32
    %1 = arith.addi %0, %arg2 : i32
    %c0_i32 = arith.constant 0 : i32
    %c0_i32_0 = arith.constant 0 : i32
    return %arg1, %c0_i32, %1 : i32, i32, i32
  }
  func.func @transform_1(%arg0: i32, %arg1: i32, %arg2: i32) -> (i32, i32) {
    %c0_i32 = arith.constant 0 : i32
    %c0_i32_0 = arith.constant 0 : i32
    %c0_i32_1 = arith.constant 0 : i32
    return %c0_i32, %c0_i32_0 : i32, i32
  }
  func.func @transform_2(%arg0: i32, %arg1: i32, %arg2: i32) -> (i32, i32, i32) {
    %c0_i32 = arith.constant 0 : i32
    %c0_i32_0 = arith.constant 0 : i32
    return %arg0, %arg1, %c0_i32 : i32, i32, i32
  }
}

</mosaic_0001>

<bundles_post_ra>
// kernel: tpu_custom_call.1
= control target key start
LH: loop header
LB: loop body
LE: loop exit
PB: predicated region body
PF: predicated region fallthrough
CT: control target
= control target key end

     0   :  { %7 = vsyncpa [#allocation4], 0  ;;  %s667_s9 = smov [#allocation3]   ;;  %s791_s0 = inlined_call_operand.hbm [shape: f32[8,32,128], index: 0, kind: input, shape index: {}]   ;;  %s792_s1 = inlined_call_operand.vmem [shape: f32[32,1], index: 1, kind: input, shape index: {}]   ;;  %s793_s2 = inlined_call_operand.vmem [shape: f32[1,8,1], index: 2, kind: output, shape index: {}]  }
   0x1   :  { %s16_s10 = sshll.u32 %s667_s9, 4  ;;  %s643_s13 = scalar_lea.hbm %s791_s0, 4096  ;;  %s17_s10 = int_to_ptr.vmem [resolvable:$true] %s16_s10 }
   0x2   :  { %p644_p0 = scmp.ne.s32.totalorder %s791_s0, %s643_s13  ;;  %p647_p1 = scmp.lt.u32.totalorder %s643_s13, %s791_s0 }
   0x4   :  { %p649_p2 = pnand %p647_p1, %p644_p0 }
   0x6   :  { %652 = shalt.err (!%p649_p2)
}
   0x7   :  { %s653_s18 = scalar_lea.vmem %s17_s10, 4096  ;;  %p658_p4 = scmp.lt.s32.totalorder %s17_s10, %s17_s10 }
   0x8   :  { %p654_p3 = scmp.ne.s32.totalorder %s17_s10, %s653_s18  ;;  %p659_p5 = scmp.lt.s32.totalorder %s653_s18, %s653_s18 }
   0xa   :  { %p660_p6 = por %p659_p5, %p658_p4 }
   0xc   :  { %p661_p7 = pnand %p660_p6, %p654_p3 }
   0xe   :  { %664 = shalt.err (!%p661_p7)
}
   0xf   :  { %s668_s19 = smov 128   ;;  %s669_s20 = smov 8  }
  0x10   :  { %22 = dma.hbm_to_vmem [thread:$0]  %s791_s0, 4096, %s17_s10, [#allocation4], %s668_s19, %s668_s19, %s669_s20  }
  0x11   :  { %665 = dma.done.wait [#allocation4], 4096  }
  0x12   :  { %666 = vsyncadd [#allocation4], 4294963200  ;;  %v69_v0 = vld [vmem:[#allocation3 + $0x20] sm:$0xff]  ;;  %v70_v2 = vld [vmem:[#allocation3 + $0x28] sm:$0xff]  ;;  %v670_v35 = vmov 0.0|0.0   ;;  %vm671_vm0 = vmmov 0   ;;  %v360_v54 = vlaneseq }
  0x13   :  { %v65_v1 = vld [vmem:[#allocation3] sm:$0xff]  ;;  %236 = vadd.xlane.f32.xlu1 %v69_v0  ;;  %v66_v3 = vld [vmem:[#allocation3 + $0x8] sm:$0xff]  ;;  %v71_v4 = vld [vmem:[#allocation3 + $0x30] sm:$0xff]  ;;  %631 = vmatprep.subr.bf16.mxu0 %v670_v35  ;;  %v672_v39 = vmov 0.0   ;;  %vm371_vm1 = vcmask 130112   ;;  %vm378_vm2 = vcmask 195712  }
  0x14   :  { %228 = vadd.xlane.f32.xlu0 %v65_v1  ;;  %v67_v5 = vld [vmem:[#allocation3 + $0x10] sm:$0xff]  ;;  %v74_v6 = vld [vmem:[#allocation3 + $0x48] sm:$0xff]  ;;  %v73_v7 = vld [vmem:[#allocation3 + $0x40] sm:$0xff]  ;;  %628 = vmatprep.mubr.msk.f32.mxu0 %vm671_vm0, %v672_v39  ;;  %v361_v57 = vand.u32 127, %v360_v54  ;;  %v363_v58 = vshrl.u32 %v360_v54, 7  ;;  %vm385_vm3 = vcmask 261312  }
  0x15   :  { %v72_v8 = vld [vmem:[#allocation3 + $0x38] sm:$0xff]  ;;  %v77_v10 = vld [vmem:[#allocation3 + $0x60] sm:$0xff]  ;;  %v75_v11 = vld [vmem:[#allocation3 + $0x50] sm:$0xff]  ;;  %vm520_vm4 = vcmask 1041409   ;;  %vm522_vm5 = vcmask 1042434   ;;  %vm524_vm6 = vcmask 1043459  }
  0x16   :  { %v68_v9 = vld [vmem:[#allocation3 + $0x18] sm:$0xff]  ;;  %v78_v13 = vld [vmem:[#allocation3 + $0x68] sm:$0xff]  ;;  %v81_v14 = vld [vmem:[#allocation3 + $0x80] sm:$0xff]  ;;  %v366_v61 = vadd.s32 4294967288, %v361_v57  ;;  %v373_v62 = vadd.s32 4294967280, %v361_v57  ;;  %v380_v63 = vadd.s32 4294967272, %v361_v57  ;;  %v714_v0 = vsub.s32 %v361_v57, %v363_v58 }
  0x17   :  { %238 = vadd.xlane.f32.xlu1 %v70_v2  ;;  %v76_v12 = vld [vmem:[#allocation3 + $0x58] sm:$0xff]  ;;  %v79_v15 = vld [vmem:[#allocation3 + $0x70] sm:$0xff]  ;;  %v82_v17 = vld [vmem:[#allocation3 + $0x88] sm:$0xff]  ;;  %vm526_vm7 = vcmask 1044484   ;;  %vm528_vm8 = vcmask 1045509   ;;  %vm530_vm9 = vcmask 1046534  }
  0x18   :  { %230 = vadd.xlane.f32.xlu0 %v66_v3  ;;  %v80_v16 = vld [vmem:[#allocation3 + $0x78] sm:$0xff]  ;;  %v85_v18 = vld [vmem:[#allocation3 + $0xa0] sm:$0xff]  ;;  %v83_v19 = vld [vmem:[#allocation3 + $0x90] sm:$0xff]  ;;  %vm532_vm10 = vcmask 1047559   ;;  %vm534_vm11 = vcmask 261120   ;;  %vm607_vm12 = vcmask 7168  }
  0x19   :  { %v84_v20 = vld [vmem:[#allocation3 + $0x98] sm:$0xff]  ;;  %v86_v21 = vld [vmem:[#allocation3 + $0xa8] sm:$0xff]  ;;  %v89_v22 = vld [vmem:[#allocation3 + $0xc0] sm:$0xff] }
  0x1a   :  { %v87_v23 = vld [vmem:[#allocation3 + $0xb0] sm:$0xff]  ;;  %v88_v24 = vld [vmem:[#allocation3 + $0xb8] sm:$0xff]  ;;  %v90_v25 = vld [vmem:[#allocation3 + $0xc8] sm:$0xff] }
  0x1b   :  { %240 = vadd.xlane.f32.xlu1 %v71_v4  ;;  %v93_v26 = vld [vmem:[#allocation3 + $0xe0] sm:$0xff]  ;;  %v91_v27 = vld [vmem:[#allocation3 + $0xd0] sm:$0xff]  ;;  %v92_v28 = vld [vmem:[#allocation3 + $0xd8] sm:$0xff]  ;;  %v718_v4 = vsub.s32 %v366_v61, %v363_v58 }
  0x1c   :  { %232 = vadd.xlane.f32.xlu0 %v67_v5  ;;  %v94_v29 = vld [vmem:[#allocation3 + $0xe8] sm:$0xff]  ;;  %v95_v30 = vld [vmem:[#allocation3 + $0xf0] sm:$0xff]  ;;  %v96_v31 = vld [vmem:[#allocation3 + $0xf8] sm:$0xff] }
  0x1d   :  { %v324_v32 = vld [vmem:[%s792_s1] sm:$0xff]  ;;  %v325_v33 = vld [vmem:[%s792_s1 + $0x8] sm:$0xff]  ;;  %v326_v36 = vld [vmem:[%s792_s1 + $0x10] sm:$0xff] }
  0x1e   :  { %v632_v34 = vpack.c.bf16 %v325_v33, %v324_v32  ;;  %v327_v37 = vld [vmem:[%s792_s1 + $0x18] sm:$0xff] }
  0x1f   :  { %246 = vadd.xlane.f32.xlu1 %v74_v6  ;;  %v635_v38 = vpack.c.bf16 %v327_v37, %v326_v36 }
  0x20   :  { %244 = vadd.xlane.f32.xlu0 %v73_v7  ;;  %633 = vmatpush3.bf16.msra.mxu0 %v632_v34  ;;  %v720_v7 = vsub.s32 %v373_v62, %v363_v58 }
  0x21   :  { %634 = vmatprep.subr.bf16.mxu0 %v670_v35 }
  0x23   :  { %242 = vadd.xlane.f32.xlu1 %v72_v8 }
  0x24   :  { %234 = vadd.xlane.f32.xlu0 %v68_v9  ;;  %636 = vmatpush3.bf16.msra.mxu0 %v635_v38 }
  0x27   :  { %252 = vadd.xlane.f32.xlu1 %v77_v10 }
  0x28   :  { %248 = vadd.xlane.f32.xlu0 %v75_v11  ;;  %v722_v11 = vsub.s32 %v380_v63, %v363_v58 }
  0x2b   :  { %250 = vadd.xlane.f32.xlu1 %v76_v12 }
  0x2c   :  { %254 = vadd.xlane.f32.xlu0 %v78_v13 }
  0x2f   :  { %260 = vadd.xlane.f32.xlu1 %v81_v14 }
  0x30   :  { %256 = vadd.xlane.f32.xlu0 %v79_v15 }
  0x33   :  { %258 = vadd.xlane.f32.xlu1 %v80_v16 }
  0x34   :  { %262 = vadd.xlane.f32.xlu0 %v82_v17 }
  0x37   :  { %268 = vadd.xlane.f32.xlu1 %v85_v18 }
  0x38   :  { %264 = vadd.xlane.f32.xlu0 %v83_v19 }
  0x3b   :  { %266 = vadd.xlane.f32.xlu1 %v84_v20 }
  0x3c   :  { %270 = vadd.xlane.f32.xlu0 %v86_v21 }
  0x3f   :  { %276 = vadd.xlane.f32.xlu1 %v89_v22 }
  0x40   :  { %272 = vadd.xlane.f32.xlu0 %v87_v23 }
  0x43   :  { %274 = vadd.xlane.f32.xlu1 %v88_v24 }
  0x44   :  { %278 = vadd.xlane.f32.xlu0 %v90_v25 }
  0x47   :  { %284 = vadd.xlane.f32.xlu1 %v93_v26 }
  0x48   :  { %280 = vadd.xlane.f32.xlu0 %v91_v27 }
  0x4b   :  { %282 = vadd.xlane.f32.xlu1 %v92_v28 }
  0x4c   :  { %286 = vadd.xlane.f32.xlu0 %v94_v29 }
  0x4f   :  { %290 = vadd.xlane.f32.xlu1 %v96_v31 }
  0x50   :  { %288 = vadd.xlane.f32.xlu0 %v95_v30 }
  0xa0   :  { %v237_v40 = vpop.xlane.xlu1 %236 }
  0xa1   :  { %v229_v41 = vpop.xlane.xlu0 %228  ;;  %v296_v3 = vmul.f32 0.03125, %v237_v40 }
  0xa2   :  { %v292_v10 = vmul.f32 0.03125, %v229_v41 }
  0xa3   :  { %v390_v16 = vrot.slane %v296_v3, %v714_v0 }
  0xa4   :  { %v239_v42 = vpop.xlane.xlu1 %238  ;;  %v365_v23 = vrot.slane %v292_v10, %v714_v0 }
  0xa5   :  { %v231_v43 = vpop.xlane.xlu0 %230  ;;  %v297_v5 = vmul.f32 0.03125, %v239_v42 }
  0xa6   :  { %v293_v6 = vmul.f32 0.03125, %v231_v43 }
  0xa7   :  { %v394_v17 = vrot.slane %v297_v5, %v718_v4 }
  0xa8   :  { %v241_v44 = vpop.xlane.xlu1 %240  ;;  %v370_v18 = vrot.slane %v293_v6, %v718_v4 }
  0xa9   :  { %v233_v45 = vpop.xlane.xlu0 %232  ;;  %v298_v8 = vmul.f32 0.03125, %v241_v44  ;;  %v395_v29 = vsel %vm371_vm1, %v394_v17, %v390_v16 }
  0xaa   :  { %v294_v9 = vmul.f32 0.03125, %v233_v45  ;;  %v372_v30 = vsel %vm371_vm1, %v370_v18, %v365_v23 }
  0xab   :  { %v399_v19 = vrot.slane %v298_v8, %v720_v7 }
  0xac   :  { %v247_v46 = vpop.xlane.xlu1 %246  ;;  %v377_v20 = vrot.slane %v294_v9, %v720_v7 }
  0xad   :  { %v245_v47 = vpop.xlane.xlu0 %244  ;;  %v301_v21 = vmul.f32 0.03125, %v247_v46  ;;  %v400_v32 = vsel %vm378_vm2, %v399_v19, %v395_v29 }
  0xae   :  { %v300_v22 = vmul.f32 0.03125, %v245_v47  ;;  %v379_v33 = vsel %vm378_vm2, %v377_v20, %v372_v30 }
  0xaf   :  { %v413_v34 = vrot.slane %v301_v21, %v718_v4 }
  0xb0   :  { %v243_v48 = vpop.xlane.xlu1 %242  ;;  %v409_v35 = vrot.slane %v300_v22, %v714_v0 }
  0xb1   :  { %v235_v49 = vpop.xlane.xlu0 %234  ;;  %v299_v12 = vmul.f32 0.03125, %v243_v48 }
  0xb2   :  { %v295_v13 = vmul.f32 0.03125, %v235_v49  ;;  %v414_v45 = vsel %vm371_vm1, %v413_v34, %v409_v35 }
  0xb3   :  { %v404_v24 = vrot.slane %v299_v12, %v722_v11 }
  0xb4   :  { %v253_v50 = vpop.xlane.xlu1 %252  ;;  %v384_v25 = vrot.slane %v295_v13, %v722_v11 }
  0xb5   :  { %v249_v51 = vpop.xlane.xlu0 %248  ;;  %v405_v36 = vsel %vm385_vm3, %v404_v24, %v400_v32  ;;  %v304_v43 = vmul.f32 0.03125, %v253_v50 }
  0xb6   :  { %v302_v26 = vmul.f32 0.03125, %v249_v51  ;;  %v386_v37 = vsel %vm385_vm3, %v384_v25, %v379_v33 }
  0xb7   :  { %v521_v46 = vsel %vm520_vm4, %v405_v36, %v386_v37  ;;  %v428_v61 = vrot.slane %v304_v43, %v714_v0 }
  0xb8   :  { %v251_v52 = vpop.xlane.xlu1 %250  ;;  %v418_v38 = vrot.slane %v302_v26, %v720_v7 }
  0xb9   :  { %v255_v53 = vpop.xlane.xlu0 %254  ;;  %v303_v31 = vmul.f32 0.03125, %v251_v52 }
  0xba   :  { %v305_v39 = vmul.f32 0.03125, %v255_v53  ;;  %v419_v48 = vsel %vm378_vm2, %v418_v38, %v414_v45 }
  0xbb   :  { %v423_v44 = vrot.slane %v303_v31, %v722_v11 }
  0xbc   :  { %v261_v55 = vpop.xlane.xlu1 %260  ;;  %v432_v49 = vrot.slane %v305_v39, %v718_v4 }
  0xbd   :  { %v712_v56 = vpop.xlane.xlu0 %256  ;;  %v308_v47 = vmul.f32 0.03125, %v261_v55  ;;  %v424_v55 = vsel %vm385_vm3, %v423_v44, %v419_v48 }
  0xbe   :  { %v306_v51 = vmul.f32 0.03125, %v712_v56  ;;  %v523_v38 = vsel %vm522_vm5, %v424_v55, %v521_v46 }
  0xbf   :  { %v447_v3 = vrot.slane %v308_v47, %v714_v0 }
  0xc0   :  { %v259_v59 = vpop.xlane.xlu1 %258  ;;  %v437_v6 = vrot.slane %v306_v51, %v720_v7 }
  0xc1   :  { %v263_v60 = vpop.xlane.xlu0 %262  ;;  %v307_v53 = vmul.f32 0.03125, %v259_v59  ;;  %v433_v59 = vsel %vm371_vm1, %v432_v49, %v428_v61 }
  0xc2   :  { %v309_v40 = vmul.f32 0.03125, %v263_v60  ;;  %v438_v24 = vsel %vm378_vm2, %v437_v6, %v433_v59 }
  0xc3   :  { %v442_v10 = vrot.slane %v307_v53, %v722_v11 }
  0xc4   :  { %v716_v1 = vpop.xlane.xlu1 %268  ;;  %v451_v54 = vrot.slane %v309_v40, %v718_v4 }
  0xc5   :  { %v265_v2 = vpop.xlane.xlu0 %264  ;;  %v312_v56 = vmul.f32 0.03125, %v716_v1 }
  0xc6   :  { %v310_v52 = vmul.f32 0.03125, %v265_v2  ;;  %v452_v12 = vsel %vm371_vm1, %v451_v54, %v447_v3 }
  0xc7   :  { %v466_v20 = vrot.slane %v312_v56, %v714_v0 }
  0xc8   :  { %v267_v14 = vpop.xlane.xlu1 %266  ;;  %v456_v8 = vrot.slane %v310_v52, %v720_v7 }
  0xc9   :  { %v271_v15 = vpop.xlane.xlu0 %270  ;;  %v311_v50 = vmul.f32 0.03125, %v267_v14 }
  0xca   :  { %v313_v57 = vmul.f32 0.03125, %v271_v15  ;;  %v457_v25 = vsel %vm378_vm2, %v456_v8, %v452_v12 }
  0xcb   :  { %v461_v13 = vrot.slane %v311_v50, %v722_v11 }
  0xcc   :  { %v277_v27 = vpop.xlane.xlu1 %276  ;;  %v470_v14 = vrot.slane %v313_v57, %v718_v4 }
  0xcd   :  { %v273_v28 = vpop.xlane.xlu0 %272  ;;  %v316_v9 = vmul.f32 0.03125, %v277_v27  ;;  %v462_v29 = vsel %vm385_vm3, %v461_v13, %v457_v25 }
  0xce   :  { %v314_v62 = vmul.f32 0.03125, %v273_v28  ;;  %v443_v28 = vsel %vm385_vm3, %v442_v10, %v438_v24  ;;  %v471_v30 = vsel %vm371_vm1, %v470_v14, %v466_v20 }
  0xcf   :  { %v485_v26 = vrot.slane %v316_v9, %v714_v0 }
  0xd0   :  { %v275_v41 = vpop.xlane.xlu1 %274  ;;  %v475_v16 = vrot.slane %v314_v62, %v720_v7 }
  0xd1   :  { %v279_v42 = vpop.xlane.xlu0 %278  ;;  %v315_v2 = vmul.f32 0.03125, %v275_v41 }
  0xd2   :  { %v317_v63 = vmul.f32 0.03125, %v279_v42  ;;  %v476_v34 = vsel %vm378_vm2, %v475_v16, %v471_v30  ;;  %v525_v42 = vsel %vm524_vm6, %v443_v28, %v523_v38 }
  0xd3   :  { %v480_v21 = vrot.slane %v315_v2, %v722_v11  ;;  %v527_v45 = vsel %vm526_vm7, %v462_v29, %v525_v42 }
  0xd4   :  { %v285_v58 = vpop.xlane.xlu1 %284  ;;  %v489_v17 = vrot.slane %v317_v63, %v718_v4 }
  0xd5   :  { %v281_v60 = vpop.xlane.xlu0 %280  ;;  %v320_v22 = vmul.f32 0.03125, %v285_v58  ;;  %v481_v39 = vsel %vm385_vm3, %v480_v21, %v476_v34 }
  0xd6   :  { %v318_v5 = vmul.f32 0.03125, %v281_v60  ;;  %v490_v35 = vsel %vm371_vm1, %v489_v17, %v485_v26  ;;  %v529_v48 = vsel %vm528_vm8, %v481_v39, %v527_v45 }
  0xd7   :  { %v504_v40 = vrot.slane %v320_v22, %v714_v0 }
  0xd8   :  { %v283_v1 = vpop.xlane.xlu1 %282  ;;  %v494_v23 = vrot.slane %v318_v5, %v720_v7 }
  0xd9   :  { %v287_v15 = vpop.xlane.xlu0 %286  ;;  %v319_v18 = vmul.f32 0.03125, %v283_v1 }
  0xda   :  { %v321_v19 = vmul.f32 0.03125, %v287_v15  ;;  %v495_v41 = vsel %vm378_vm2, %v494_v23, %v490_v35 }
  0xdb   :  { %v499_v27 = vrot.slane %v319_v18, %v722_v11 }
  0xdc   :  { %v508_v31 = vrot.slane %v321_v19, %v718_v4  ;;  %v291_v33 = vpop.xlane.xlu1 %290 }
  0xdd   :  { %v289_v32 = vpop.xlane.xlu0 %288  ;;  %v323_v37 = vmul.f32 0.03125, %v291_v33  ;;  %v500_v4 = vsel %vm385_vm3, %v499_v27, %v495_v41 }
  0xde   :  { %v322_v36 = vmul.f32 0.03125, %v289_v32  ;;  %v509_v47 = vsel %vm371_vm1, %v508_v31, %v504_v40  ;;  %v531_v49 = vsel %vm530_vm9, %v500_v4, %v529_v48 }
  0xdf   :  { %v518_v44 = vrot.slane %v323_v37, %v722_v11 }
  0xe0   :  { %v513_v43 = vrot.slane %v322_v36, %v720_v7 }
  0xe2   :  { %v514_v46 = vsel %vm378_vm2, %v513_v43, %v509_v47 }
  0xe3   :  { %v519_v0 = vsel %vm385_vm3, %v518_v44, %v514_v46 }
  0xe4   :  { %v533_v51 = vsel %vm532_vm10, %v519_v0, %v531_v49 }
  0xe5   :  { %629 = vmatmul.mubr.msk.f32.vlgmr.msra.gmra.mrb[0].mxu0 %vm534_vm11, %v533_v51 }
 0x1b8   :  { %v603_v7 = vpop.f32.mrb[0].mxu0 }
 0x1b9   :  { %608 = vst.msk [vmem:[%s793_s2] sm:$0xff] %vm607_vm12, %v603_v7  ;;  %v630_v11 = vpop.f32.mrb[1].mxu0 }
 0x1ba   :  { %613 = vsyncpa [#allocation4], 1 }

</bundles_post_ra>
